<compile_context>
chip_gen: v7x
topology: tpu7x:2x2x1
jax: 0.10.0
libtpu: 0.0.40
codegen_flags: <defaults>
</compile_context>

<pallas_src>
import jax
import jax.numpy as jnp
from jax.experimental import pallas as pl
from jax.experimental.pallas import tpu as pltpu


def _round_up(n, m):
    return ((n + m - 1) // m) * m


def _round_down(n, m):
    return (n // m) * m


# Sublane multiple per element size (f32 -> 8, bf16 -> 16, int8/fp8 -> 32).
_SUBLANE = {4: 8, 2: 16, 1: 32}


def _vmem_capacity_bytes():
    """Generation-aware VMEM capacity; conservative fallback (v7x = 64 MiB/TC)."""
    try:
        return int(pltpu.get_tpu_info().vmem_capacity_bytes)
    except Exception:
        return 64 << 20


def critic_kernel(x_ref, w_ref, b_ref, o_ref):
    # x_ref: (TB, D)   w_ref: (1, D)   b_ref: (1,) in SMEM   o_ref: (TB, 1)
    # GEMV as VALU multiply + XLU lane-reduction: keeps the weight lane-major
    # (no 128x lane-padded (D,1) tile) and keeps the MXU out of an N=1 matmul.
    x = x_ref[...].astype(jnp.float32)
    w = w_ref[...]                                    # (1, D) f32, broadcasts over rows
    acc = jnp.sum(x * w, axis=-1, keepdims=True)      # (TB, 1) f32 accumulation
    o_ref[...] = (acc + b_ref[0]).astype(o_ref.dtype)


@jax.jit
def critic_forward(x, w, b):
    """Forward of Critic: x (B, D), w (1, D) [== torch fc.weight], b (1,) -> (B,)."""
    B, D = x.shape
    itemsize = jnp.dtype(x.dtype).itemsize
    sub = _SUBLANE.get(itemsize, 8)
    pad_d = _round_up(D, 128)                         # lane-padded row width in VMEM

    # --- Tile sizing: size TB by bytes, not rows. ---------------------------
    cap = _vmem_capacity_bytes()
    # VMEM bytes per row of one pipelined buffer: lane-padded x row plus the
    # lane-padded (row, 1) f32 output row.
    row_bytes = pad_d * itemsize + 128 * 4
    # Double-buffered x+out tiles kept within ~55% of VMEM; each x buffer
    # capped at 16 MiB (past ~85% of HBM roofline, diminishing returns).
    per_buf_budget = min(16 << 20, (cap * 55 // 100) // 2)
    tb = _round_down(max(per_buf_budget // row_bytes, sub), sub)
    tb = max(sub, min(tb, _round_up(B, sub)))         # never exceed the batch

    # No whole-array pad of x: Pallas clamps the ragged last block (rows are
    # independent). Output is over-allocated to G*TB rows so stores are always
    # full blocks, then sliced back to B outside.
    grid_b = pl.cdiv(B, tb)
    bp = grid_b * tb

    # --- VMEM budget with lane-padded footprints. ---------------------------
    need = 2 * tb * row_bytes + 2 * 8 * pad_d * 4 + (2 << 20)
    vmem_limit = int(min(max(need, 32 << 20), cap - (4 << 20)))

    out = pl.pallas_call(
        critic_kernel,
        out_shape=jax.ShapeDtypeStruct((bp, 1), jnp.float32),
        grid=(grid_b,),
        in_specs=[
            pl.BlockSpec((tb, D), lambda i: (i, 0)),            # x: batch-tiled, auto double-buffered
            pl.BlockSpec((1, D), lambda i: (0, 0)),             # weight: lane-major, resident in VMEM
            pl.BlockSpec(memory_space=pltpu.MemorySpace.SMEM),  # bias scalar in SMEM
        ],
        out_specs=pl.BlockSpec((tb, 1), lambda i: (i, 0)),
        compiler_params=pltpu.CompilerParams(
            # Portable choice; on v7x, CORE_PARALLEL would shard the batch
            # axis across the two TensorCores for ~2x HBM bandwidth.
            dimension_semantics=("parallel",),
            vmem_limit_bytes=vmem_limit,
        ),
    )(x, w, b)

    # squeeze(-1) + drop the over-allocated rows -> matches fc(x).squeeze(-1).
    return out[:B, 0]


def init_critic_params(input_dim):
    """Deterministic init matching the module: zero weight, zero bias."""
    w = jnp.zeros((1, input_dim), dtype=jnp.float32)   # == torch fc.weight (1, D)
    b = jnp.zeros((1,), dtype=jnp.float32)             # == torch fc.bias
    return w, b


if __name__ == "__main__":
    key = jax.random.PRNGKey(0)
    kx, kw, kb, kx2 = jax.random.split(key, 4)

    B, D = 16, 32                       # small shapes: batch=16, input_dim=32
    x = jax.random.normal(kx, (B, D), dtype=jnp.float32)

    # 1) Zero-init params (exact module semantics) -> all-zero values.
    w0, b0 = init_critic_params(D)
    v0 = jax.block_until_ready(critic_forward(x, w0, b0))
    assert v0.shape == (B,), v0.shape
    assert jnp.allclose(v0, jnp.zeros((B,), jnp.float32), atol=1e-6)

    # 2) Random params to exercise the multiply/reduce + bias path.
    w = jax.random.normal(kw, (1, D), dtype=jnp.float32)
    b = jax.random.normal(kb, (1,), dtype=jnp.float32)
    v = jax.block_until_ready(critic_forward(x, w, b))
    ref = x @ w[0] + b[0]
    assert v.shape == (B,), v.shape
    assert jnp.allclose(v, ref, atol=1e-5, rtol=1e-5), (v, ref)

    # 3) Batch not a multiple of the sublane/tile -> ragged last-block path.
    B2 = 10
    x2 = jax.random.normal(kx2, (B2, D), dtype=jnp.float32)
    v2 = jax.block_until_ready(critic_forward(x2, w, b))
    ref2 = x2 @ w[0] + b[0]
    assert v2.shape == (B2,), v2.shape
    assert jnp.allclose(v2, ref2, atol=1e-5, rtol=1e-5), (v2, ref2)

    print("KERNEL_OK")
</pallas_src>

<mosaic_0001>
module attributes {stable_mosaic.version = 11 : i64} {
  func.func @critic_kernel(%arg0: i32, %arg1: memref<16x32xf32, #tpu.memory_space<vmem>>, %arg2: memref<1x32xf32, #tpu.memory_space<vmem>>, %arg3: memref<1xf32, #tpu.memory_space<smem>>, %arg4: memref<16x1xf32, #tpu.memory_space<vmem>>) attributes {dimension_semantics = [#tpu.dimension_semantics<parallel>], iteration_bounds = array<i64: 1>, scalar_prefetch = 0 : i64, scratch_operands = 0 : i64, tpu.core_type = #tpu.core_type<tc>, window_params = [{transform_indices = @transform_0, window_bounds = array<i64: 16, 32>}, {pipeline_mode = #tpu.pipeline_mode<synchronous>, transform_indices = @transform_1, window_bounds = array<i64: 1, 32>}, {transform_indices = @transform_2, window_bounds = array<i64: 1>}, {transform_indices = @transform_3, window_bounds = array<i64: 16, 1>}]} {
    %c0 = arith.constant 0 : index
    %c0_0 = arith.constant 0 : index
    %0 = vector.load %arg1[%c0, %c0_0] : memref<16x32xf32, #tpu.memory_space<vmem>>, vector<16x32xf32>
    %c0_1 = arith.constant 0 : index
    %c0_2 = arith.constant 0 : index
    %1 = vector.load %arg2[%c0_1, %c0_2] : memref<1x32xf32, #tpu.memory_space<vmem>>, vector<1x32xf32>
    %2 = vector.broadcast %1 : vector<1x32xf32> to vector<16x32xf32>
    %3 = arith.mulf %0, %2 : vector<16x32xf32>
    %cst = arith.constant dense<0.000000e+00> : vector<16xf32>
    %4 = vector.multi_reduction <add>, %3, %cst [1] : vector<16x32xf32> to vector<16xf32>
    %5 = vector.shape_cast %4 : vector<16xf32> to vector<16x1xf32>
    %c0_3 = arith.constant 0 : index
    %6 = memref.load %arg3[%c0_3] : memref<1xf32, #tpu.memory_space<smem>>
    %7 = vector.broadcast %6 : f32 to vector<16x1xf32>
    %8 = arith.addf %5, %7 : vector<16x1xf32>
    %c0_4 = arith.constant 0 : index
    %c0_5 = arith.constant 0 : index
    %9 = vector.load %arg4[%c0_4, %c0_5] : memref<16x1xf32, #tpu.memory_space<vmem>>, vector<16x1xf32>
    tpu.vector_store %arg4[%c0_4, %c0_5], %8 {strides = array<i32>} : memref<16x1xf32, #tpu.memory_space<vmem>>, vector<16x1xf32>,
    return
  }
  func.func @transform_0(%arg0: i32) -> (i32, i32) {
    %c0_i32 = arith.constant 0 : i32
    %c0_i32_0 = arith.constant 0 : i32
    return %arg0, %c0_i32 : i32, i32
  }
  func.func @transform_1(%arg0: i32) -> (i32, i32) {
    %c0_i32 = arith.constant 0 : i32
    %c0_i32_0 = arith.constant 0 : i32
    %c0_i32_1 = arith.constant 0 : i32
    return %c0_i32, %c0_i32_0 : i32, i32
  }
  func.func @transform_2(%arg0: i32) -> i32 {
    %c0_i32 = arith.constant 0 : i32
    %c0_i32_0 = arith.constant 0 : i32
    return %c0_i32 : i32
  }
  func.func @transform_3(%arg0: i32) -> (i32, i32) {
    %c0_i32 = arith.constant 0 : i32
    %c0_i32_0 = arith.constant 0 : i32
    return %arg0, %c0_i32 : i32, i32
  }
}

</mosaic_0001>

<bundles_post_ra>
// kernel: critic_forward.1
= control target key start
LH: loop header
LB: loop body
LE: loop exit
PB: predicated region body
PF: predicated region fallthrough
CT: control target
= control target key end

     0   :  { %9 = vsyncpa [#allocation4], 0  ;;  %s87_s12 = smov [#allocation3]   ;;  %s134_s0 = inlined_call_operand.hbm [shape: f32[16,32], index: 0, kind: input, shape index: {}]   ;;  %s135_s1 = inlined_call_operand.vmem [shape: f32[1,32], index: 1, kind: input, shape index: {}]   ;;  %s136_s2 = inlined_call_operand.<no memory space> [shape: f32[1], index: 2, kind: input, shape index: {}]   ;;  %s137_s3 = inlined_call_operand.vmem [shape: f32[16,1], index: 3, kind: output, shape index: {}]  }
   0x1   :  { %s15_s13 = sshll.u32 %s87_s12, 4  ;;  %s63_s16 = scalar_lea.hbm %s134_s0, 256  ;;  %s16_s13 = int_to_ptr.vmem [resolvable:$true] %s15_s13 }
   0x2   :  { %p64_p0 = scmp.ne.s32.totalorder %s134_s0, %s63_s16  ;;  %p67_p1 = scmp.lt.u32.totalorder %s63_s16, %s134_s0 }
   0x4   :  { %p69_p2 = pnand %p67_p1, %p64_p0 }
   0x6   :  { %72 = shalt.err (!%p69_p2)
}
   0x7   :  { %s73_s21 = scalar_lea.vmem %s16_s13, 256  ;;  %p78_p4 = scmp.lt.s32.totalorder %s16_s13, %s16_s13 }
   0x8   :  { %p74_p3 = scmp.ne.s32.totalorder %s16_s13, %s73_s21  ;;  %p79_p5 = scmp.lt.s32.totalorder %s73_s21, %s73_s21 }
   0xa   :  { %p80_p6 = por %p79_p5, %p78_p4 }
   0xc   :  { %p81_p7 = pnand %p80_p6, %p74_p3 }
   0xe   :  { %84 = shalt.err (!%p81_p7)
}
   0xf   :  { %s88_s22 = smov 128   ;;  %s89_s23 = smov 8  }
  0x10   :  { %21 = dma.hbm_to_vmem [thread:$0]  %s134_s0, 256, %s16_s13, [#allocation4], %s88_s22, %s88_s22, %s89_s23  }
  0x11   :  { %85 = dma.done.wait [#allocation4], 256  }
  0x12   :  { %86 = vsyncadd [#allocation4], 4294967040  ;;  %v29_v0 = vld [vmem:[#allocation3] sm:$0xff]  ;;  %vm40_vm0 = vcmask 261120   ;;  %v30_v2 = vld [vmem:[#allocation3 + $0x8] sm:$0xff]  ;;  %v48_v7 = vstv %s136_s2  ;;  %vm51_vm1 = vcmask 7168  }
  0x13   :  { %v59_v1 = vld [vmem:[%s135_s1] ss:$0 sm:$0xff] }
  0x14   :  { %v38_v3 = vmul.f32 %v59_v1, %v29_v0  ;;  %v39_v4 = vmul.f32 %v59_v1, %v30_v2 }
  0x16   :  { %v41_v5 = vsel %vm40_vm0, %v38_v3, 0.0  ;;  %v44_v6 = vsel %vm40_vm0, %v39_v4, 0.0 }
  0x17   :  { %42 = vadd.xlane.f32.xlu0 %v41_v5 }
  0x1b   :  { %45 = vadd.xlane.f32.xlu0 %v44_v6 }
  0xa4   :  { %v43_v8 = vpop.xlane.xlu0 %42 }
  0xa5   :  { %v49_v9 = vadd.f32 %v48_v7, %v43_v8 }
  0xa7   :  { %52 = vst.msk [vmem:[%s137_s3] sm:$0xff] %vm51_vm1, %v49_v9 }
  0xa8   :  { %v46_v10 = vpop.xlane.xlu0 %45 }
  0xa9   :  { %v50_v11 = vadd.f32 %v48_v7, %v46_v10 }
  0xab   :  { %53 = vst.msk [vmem:[%s137_s3 + $0x8] sm:$0xff] %vm51_vm1, %v50_v11 }
  0xac   :  { %58 = vsyncpa [#allocation4], 1 }

</bundles_post_ra>
